<compile_context>
chip_gen: v7x
topology: tpu7x:2x2x1
jax: 0.10.0
libtpu: 0.0.40
codegen_flags: <defaults>
</compile_context>

<pallas_src>
import functools

import jax
import jax.numpy as jnp
from jax.experimental import pallas as pl
from jax.experimental.pallas import tpu as pltpu

LN_EPS = 1e-5


# --------------------------- small host-side helpers -------------------------
def _round_up(n, m):
    return ((n + m - 1) // m) * m


def _choose_block(batch, batch_block):
    """Pick a lane-dense batch tile (multiple of 128)."""
    blk = min(batch_block, _round_up(max(batch, 1), 128))
    # For large batches keep >= ~4-8 grid steps so v7x's 2 TensorCores split the
    # "parallel" axis AND each core still pipelines x/out DMA, without dropping
    # below 512-lane tiles.
    if batch >= 4 * 512:
        blk = min(blk, max(512, _round_up(-(-batch // 8), 128)))
    return _round_up(max(blk, 128), 128)


def precompute_graph(edge_logits, edge_strengths):
    """x-independent causal-graph math (plain jnp; XLA constant-folds/fuses).

    Returns (adjacency [V,V], propagation matrix (I+W)^V [V,V]).
    NOTE: if edge parameters change (training), recompute — a cached result is
    stale.
    """
    V = edge_logits.shape[0]
    eye = jnp.eye(V, dtype=jnp.float32)
    # Mask applies to the *logits* (diag of adjacency = sigmoid(0) = 0.5),
    # exactly matching the PyTorch module.
    adj = jax.nn.sigmoid(edge_logits * (1.0 - eye))
    weighted_adj = adj * jnp.tanh(edge_strengths)
    # eff += eff @ W repeated V times  ==  eff = cv @ (I + W)^V
    prop = jnp.linalg.matrix_power(eye + weighted_adj, V)
    return adj, prop


# ------------------------------ fused kernel --------------------------------
def _causal_reasoning_kernel(x_ref, w_enc1_ref, w_enc2f_ref, w_dec1_ref,
                             w_dec2_ref, vec_ref, out_ref, *, compute_dtype):
    """Lane-dense (batch-on-lanes) fused forward.

    x_ref      : [D, Bt]      transposed input tile (batch on lanes)
    w_enc1_ref : [H, D]       encoder Linear1 weight (out,in)
    w_enc2f_ref: [2V, H]      fused [enc_w2 ; enc_w2 @ prop]^T
    w_dec1_ref : [H, V]       decoder Linear1 weight (out,in)
    w_dec2_ref : [D, H]       decoder Linear2 weight (out,in)
    vec_ref    : [F, 8]       column-packed vectors (biases / LN affine)
    out_ref    : [D+2V, Bt]   packed transposed output: output | cv | eff
    """
    D = x_ref.shape[0]
    H = w_enc1_ref.shape[0]
    V2 = w_enc2f_ref.shape[0]
    V = V2 // 2

    def mm(w, a):
        return jnp.dot(w.astype(compute_dtype), a.astype(compute_dtype),
                       preferred_element_type=jnp.float32)

    def layer_norm(h, gamma, beta):
        # Feature axis is the sublane axis -> cheap sublane reduce.
        mu = jnp.mean(h, axis=0, keepdims=True)
        var = jnp.mean((h - mu) ** 2, axis=0, keepdims=True)
        return (h - mu) * jax.lax.rsqrt(var + LN_EPS) * gamma + beta

    # Column-packed per-feature vectors (each [feat, 1], lane-broadcast later).
    enc_b1 = vec_ref[0:H, 0:1]
    enc_g = vec_ref[0:H, 1:2]
    enc_be = vec_ref[0:H, 2:3]
    enc_b2f = vec_ref[0:V2, 3:4]
    dec_b1 = vec_ref[0:H, 4:5]
    dec_g = vec_ref[0:H, 5:6]
    dec_be = vec_ref[0:H, 6:7]
    dec_b2 = vec_ref[0:D, 7:8]

    x = x_ref[...]

    # ----- encoder: Linear -> LayerNorm -> ReLU -> Linear (fused with prop) --
    h = mm(w_enc1_ref[...], x) + enc_b1                      # [H, Bt]
    h = jnp.maximum(layer_norm(h, enc_g, enc_be), 0.0)
    cv_eff = mm(w_enc2f_ref[...], h) + enc_b2f               # [2V, Bt]
    cv = cv_eff[0:V, :]
    eff = cv_eff[V:V2, :]

    # ----- decoder: Linear -> LayerNorm -> ReLU -> Linear --------------------
    d = mm(w_dec1_ref[...], eff) + dec_b1                    # [H, Bt]
    d = jnp.maximum(layer_norm(d, dec_g, dec_be), 0.0)
    out = mm(w_dec2_ref[...], d) + dec_b2                    # [D, Bt]

    # Single lane-dense store of the packed slab (rows: output | cv | eff).
    out_ref[...] = jnp.concatenate([out, cv, eff], axis=0)


# --------------------------------- wrapper -----------------------------------
def causal_reasoning_forward(x, params, graph=None, batch_block=1024,
                             compute_dtype=jnp.float32):
    """CausalReasoning.forward (intervention_query=None path).

    Returns dict: output [B,D], causal_variables [B,V], effects [B,V],
    intervention_mask=None, adjacency_matrix [V,V].

    `graph` may be a cached result of precompute_graph(...) (must be
    recomputed whenever edge parameters change).  compute_dtype=jnp.bfloat16
    uses the bf16 MXU path on v6e/v7x (f32 accumulation, LN stays f32).
    """
    B, D = x.shape
    H = params["enc_w1"].shape[1]
    V = params["enc_w2"].shape[1]

    if graph is None:
        adj, prop = precompute_graph(params["edge_logits"],
                                     params["edge_strengths"])
    else:
        adj, prop = graph

    # Fold the propagation matrix into the encoder's second layer:
    # [cv | eff] = h @ [enc_w2 | enc_w2 @ prop] + [enc_b2 | enc_b2 @ prop].
    enc_w2f = jnp.concatenate([params["enc_w2"], params["enc_w2"] @ prop], axis=1)
    enc_b2f = jnp.concatenate([params["enc_b2"], params["enc_b2"] @ prop], axis=1)

    # Weights transposed to [out, in] for the batch-on-lanes layout.
    w_enc1_t = params["enc_w1"].T              # [H, D]
    w_enc2f_t = enc_w2f.T                      # [2V, H]
    w_dec1_t = params["dec_w1"].T              # [H, V]
    w_dec2_t = params["dec_w2"].T              # [D, H]

    # Column-pack all per-feature vectors into one tiny [F, 8] buffer.
    F = max(H, D, 2 * V)
    vec = jnp.zeros((F, 8), jnp.float32)

    def put(buf, col, arr):
        v = arr.reshape(-1)
        return buf.at[:v.shape[0], col].set(v)

    vec = put(vec, 0, params["enc_b1"])
    vec = put(vec, 1, params["enc_gamma"])
    vec = put(vec, 2, params["enc_beta"])
    vec = put(vec, 3, enc_b2f)
    vec = put(vec, 4, params["dec_b1"])
    vec = put(vec, 5, params["dec_gamma"])
    vec = put(vec, 6, params["dec_beta"])
    vec = put(vec, 7, params["dec_b2"])

    # Always-gridded, padded batch (no monolithic-VMEM fallback).
    blk = _choose_block(B, batch_block)
    b_pad = _round_up(B, blk)
    steps = b_pad // blk
    x_t = jnp.pad(x.astype(jnp.float32).T, ((0, 0), (0, b_pad - B)))  # [D, Bp]

    out_rows = D + 2 * V
    kernel = functools.partial(_causal_reasoning_kernel,
                               compute_dtype=compute_dtype)

    packed_t = pl.pallas_call(
        kernel,
        out_shape=jax.ShapeDtypeStruct((out_rows, b_pad), jnp.float32),
        grid=(steps,),
        in_specs=[
            pl.BlockSpec((D, blk), lambda i: (0, i)),
            pl.BlockSpec(w_enc1_t.shape, lambda i: (0, 0)),
            pl.BlockSpec(w_enc2f_t.shape, lambda i: (0, 0)),
            pl.BlockSpec(w_dec1_t.shape, lambda i: (0, 0)),
            pl.BlockSpec(w_dec2_t.shape, lambda i: (0, 0)),
            pl.BlockSpec(vec.shape, lambda i: (0, 0)),
        ],
        out_specs=pl.BlockSpec((out_rows, blk), lambda i: (0, i)),
        compiler_params=pltpu.CompilerParams(
            dimension_semantics=("parallel",)),
    )(x_t, w_enc1_t, w_enc2f_t, w_dec1_t, w_dec2_t, vec)

    return {
        "output": packed_t[:D, :B].T,
        "causal_variables": packed_t[D:D + V, :B].T,
        "effects": packed_t[D + V:, :B].T,
        "intervention_mask": None,   # intervention_query=None path
        "adjacency_matrix": adj,
    }


# ------------------------------ test harness --------------------------------
def init_params(key, input_dim, hidden_dim, num_variables):
    """Deterministic synthetic init (PyTorch-Linear-like uniform bounds).

    NOTE: the PyTorch module initializes edge_logits/edge_strengths to zeros
    (weighted adjacency exactly 0); small random values are used instead so the
    propagation is non-trivial (still deterministic via key).
    """
    ks = jax.random.split(key, 6)

    def lin(k, fan_in, fan_out):
        bound = 1.0 / jnp.sqrt(fan_in)
        kw, kb = jax.random.split(k)
        w = jax.random.uniform(kw, (fan_in, fan_out), jnp.float32, -bound, bound)
        b = jax.random.uniform(kb, (1, fan_out), jnp.float32, -bound, bound)
        return w, b

    enc_w1, enc_b1 = lin(ks[0], input_dim, hidden_dim)
    enc_w2, enc_b2 = lin(ks[1], hidden_dim, num_variables)
    dec_w1, dec_b1 = lin(ks[2], num_variables, hidden_dim)
    dec_w2, dec_b2 = lin(ks[3], hidden_dim, input_dim)

    return {
        "enc_w1": enc_w1, "enc_b1": enc_b1,
        "enc_gamma": jnp.ones((1, hidden_dim), jnp.float32),
        "enc_beta": jnp.zeros((1, hidden_dim), jnp.float32),
        "enc_w2": enc_w2, "enc_b2": enc_b2,
        "edge_logits": 0.1 * jax.random.normal(
            ks[4], (num_variables, num_variables), jnp.float32),
        "edge_strengths": 0.1 * jax.random.normal(
            ks[5], (num_variables, num_variables), jnp.float32),
        "dec_w1": dec_w1, "dec_b1": dec_b1,
        "dec_gamma": jnp.ones((1, hidden_dim), jnp.float32),
        "dec_beta": jnp.zeros((1, hidden_dim), jnp.float32),
        "dec_w2": dec_w2, "dec_b2": dec_b2,
    }


def reference_forward(x, p):
    """Pure-JAX reference mirroring the PyTorch forward (intervention=None),
    including the original V-step propagation loop."""
    def ln(h, g, b):
        mu = jnp.mean(h, axis=-1, keepdims=True)
        var = jnp.mean((h - mu) ** 2, axis=-1, keepdims=True)
        return (h - mu) / jnp.sqrt(var + LN_EPS) * g + b

    h = jnp.maximum(ln(x @ p["enc_w1"] + p["enc_b1"],
                       p["enc_gamma"], p["enc_beta"]), 0.0)
    cv = h @ p["enc_w2"] + p["enc_b2"]

    V = p["edge_logits"].shape[0]
    mask = 1.0 - jnp.eye(V, dtype=jnp.float32)
    adj = jax.nn.sigmoid(p["edge_logits"] * mask)
    wadj = adj * jnp.tanh(p["edge_strengths"])

    eff = cv
    for _ in range(V):
        eff = eff + eff @ wadj

    d = jnp.maximum(ln(eff @ p["dec_w1"] + p["dec_b1"],
                       p["dec_gamma"], p["dec_beta"]), 0.0)
    out = d @ p["dec_w2"] + p["dec_b2"]
    return out, cv, eff, adj


if __name__ == "__main__":
    INPUT_DIM, HIDDEN_DIM, NUM_VARS = 32, 32, 16

    key = jax.random.PRNGKey(0)
    kx1, kx2, kp = jax.random.split(key, 3)
    params = init_params(kp, INPUT_DIM, HIDDEN_DIM, NUM_VARS)

    # 1) small batch (pads to one 128-lane tile, single grid step)
    x_small = jax.random.normal(kx1, (8, INPUT_DIM), jnp.float32)
    res = causal_reasoning_forward(x_small, params)
    jax.block_until_ready(res["output"])

    ref_out, ref_cv, ref_eff, ref_adj = reference_forward(x_small, params)
    assert jnp.allclose(res["output"], ref_out, atol=1e-4, rtol=1e-4)
    assert jnp.allclose(res["causal_variables"], ref_cv, atol=1e-4, rtol=1e-4)
    assert jnp.allclose(res["effects"], ref_eff, atol=1e-4, rtol=1e-4)
    assert jnp.allclose(res["adjacency_matrix"], ref_adj, atol=1e-5, rtol=1e-5)

    # 2) large, non-divisible batch -> padded, multi-step gridded path with the
    #    x-independent graph precomputed once and reused.
    x_big = jax.random.normal(kx2, (2000, INPUT_DIM), jnp.float32)
    graph = precompute_graph(params["edge_logits"], params["edge_strengths"])
    res_big = causal_reasoning_forward(x_big, params, graph=graph)
    jax.block_until_ready(res_big["output"])

    ref_out_b, ref_cv_b, ref_eff_b, _ = reference_forward(x_big, params)
    assert jnp.allclose(res_big["output"], ref_out_b, atol=1e-4, rtol=1e-4)
    assert jnp.allclose(res_big["causal_variables"], ref_cv_b, atol=1e-4, rtol=1e-4)
    assert jnp.allclose(res_big["effects"], ref_eff_b, atol=1e-4, rtol=1e-4)

    print("KERNEL_OK")
</pallas_src>

<mosaic_0001>
module attributes {stable_mosaic.version = 11 : i64} {
  func.func @_causal_reasoning_kernel(%arg0: i32, %arg1: memref<32x128xf32, #tpu.memory_space<vmem>>, %arg2: memref<32x32xf32, #tpu.memory_space<vmem>>, %arg3: memref<32x32xf32, #tpu.memory_space<vmem>>, %arg4: memref<32x16xf32, #tpu.memory_space<vmem>>, %arg5: memref<32x32xf32, #tpu.memory_space<vmem>>, %arg6: memref<32x8xf32, #tpu.memory_space<vmem>>, %arg7: memref<64x128xf32, #tpu.memory_space<vmem>>) attributes {dimension_semantics = [#tpu.dimension_semantics<parallel>], iteration_bounds = array<i64: 1>, scalar_prefetch = 0 : i64, scratch_operands = 0 : i64, tpu.core_type = #tpu.core_type<tc>, window_params = [{transform_indices = @transform_0, window_bounds = array<i64: 32, 128>}, {pipeline_mode = #tpu.pipeline_mode<synchronous>, transform_indices = @transform_1, window_bounds = array<i64: 32, 32>}, {pipeline_mode = #tpu.pipeline_mode<synchronous>, transform_indices = @transform_2, window_bounds = array<i64: 32, 32>}, {pipeline_mode = #tpu.pipeline_mode<synchronous>, transform_indices = @transform_3, window_bounds = array<i64: 32, 16>}, {pipeline_mode = #tpu.pipeline_mode<synchronous>, transform_indices = @transform_4, window_bounds = array<i64: 32, 32>}, {pipeline_mode = #tpu.pipeline_mode<synchronous>, transform_indices = @transform_5, window_bounds = array<i64: 32, 8>}, {transform_indices = @transform_6, window_bounds = array<i64: 64, 128>}]} {
    %c0 = arith.constant 0 : index
    %c0_0 = arith.constant 0 : index
    %0 = vector.load %arg6[%c0, %c0_0] : memref<32x8xf32, #tpu.memory_space<vmem>>, vector<32x1xf32>
    %c0_1 = arith.constant 0 : index
    %c1 = arith.constant 1 : index
    %1 = vector.load %arg6[%c0_1, %c1] : memref<32x8xf32, #tpu.memory_space<vmem>>, vector<32x1xf32>
    %c0_2 = arith.constant 0 : index
    %c2 = arith.constant 2 : index
    %2 = vector.load %arg6[%c0_2, %c2] : memref<32x8xf32, #tpu.memory_space<vmem>>, vector<32x1xf32>
    %c0_3 = arith.constant 0 : index
    %c3 = arith.constant 3 : index
    %3 = vector.load %arg6[%c0_3, %c3] : memref<32x8xf32, #tpu.memory_space<vmem>>, vector<32x1xf32>
    %c0_4 = arith.constant 0 : index
    %c4 = arith.constant 4 : index
    %4 = vector.load %arg6[%c0_4, %c4] : memref<32x8xf32, #tpu.memory_space<vmem>>, vector<32x1xf32>
    %c0_5 = arith.constant 0 : index
    %c5 = arith.constant 5 : index
    %5 = vector.load %arg6[%c0_5, %c5] : memref<32x8xf32, #tpu.memory_space<vmem>>, vector<32x1xf32>
    %c0_6 = arith.constant 0 : index
    %c6 = arith.constant 6 : index
    %6 = vector.load %arg6[%c0_6, %c6] : memref<32x8xf32, #tpu.memory_space<vmem>>, vector<32x1xf32>
    %c0_7 = arith.constant 0 : index
    %c7 = arith.constant 7 : index
    %7 = vector.load %arg6[%c0_7, %c7] : memref<32x8xf32, #tpu.memory_space<vmem>>, vector<32x1xf32>
    %c0_8 = arith.constant 0 : index
    %c0_9 = arith.constant 0 : index
    %8 = vector.load %arg1[%c0_8, %c0_9] : memref<32x128xf32, #tpu.memory_space<vmem>>, vector<32x128xf32>
    %c0_10 = arith.constant 0 : index
    %c0_11 = arith.constant 0 : index
    %9 = vector.load %arg2[%c0_10, %c0_11] : memref<32x32xf32, #tpu.memory_space<vmem>>, vector<32x32xf32>
    %cst = arith.constant dense<0.000000e+00> : vector<32x128xf32>
    %10 = tpu.matmul %9, %8, %cst {dimension_numbers = #tpu.dot_dimension_numbers<[1], [0], [0], [1], [0, 0, 1, 1], [], []>} : vector<32x32xf32>, vector<32x128xf32>, vector<32x128xf32> -> vector<32x128xf32>
    %11 = vector.broadcast %0 : vector<32x1xf32> to vector<32x128xf32>
    %12 = arith.addf %10, %11 : vector<32x128xf32>
    %cst_12 = arith.constant dense<0.000000e+00> : vector<128xf32>
    %13 = vector.multi_reduction <add>, %12, %cst_12 [0] : vector<32x128xf32> to vector<128xf32>
    %14 = vector.shape_cast %13 : vector<128xf32> to vector<1x128xf32>
    %cst_13 = arith.constant 3.200000e+01 : f32
    %15 = vector.broadcast %cst_13 : f32 to vector<1x128xf32>
    %16 = arith.divf %14, %15 : vector<1x128xf32>
    %17 = vector.broadcast %16 : vector<1x128xf32> to vector<32x128xf32>
    %18 = arith.subf %12, %17 : vector<32x128xf32>
    %19 = arith.mulf %18, %18 : vector<32x128xf32>
    %cst_14 = arith.constant dense<0.000000e+00> : vector<128xf32>
    %20 = vector.multi_reduction <add>, %19, %cst_14 [0] : vector<32x128xf32> to vector<128xf32>
    %21 = vector.shape_cast %20 : vector<128xf32> to vector<1x128xf32>
    %cst_15 = arith.constant 3.200000e+01 : f32
    %22 = vector.broadcast %cst_15 : f32 to vector<1x128xf32>
    %23 = arith.divf %21, %22 : vector<1x128xf32>
    %24 = vector.broadcast %16 : vector<1x128xf32> to vector<32x128xf32>
    %25 = arith.subf %12, %24 : vector<32x128xf32>
    %cst_16 = arith.constant 9.99999974E-6 : f32
    %26 = vector.broadcast %cst_16 : f32 to vector<1x128xf32>
    %27 = arith.addf %23, %26 : vector<1x128xf32>
    %28 = math.rsqrt %27 : vector<1x128xf32>
    %29 = vector.broadcast %28 : vector<1x128xf32> to vector<32x128xf32>
    %30 = arith.mulf %25, %29 : vector<32x128xf32>
    %31 = vector.broadcast %1 : vector<32x1xf32> to vector<32x128xf32>
    %32 = arith.mulf %30, %31 : vector<32x128xf32>
    %33 = vector.broadcast %2 : vector<32x1xf32> to vector<32x128xf32>
    %34 = arith.addf %32, %33 : vector<32x128xf32>
    %cst_17 = arith.constant 0.000000e+00 : f32
    %35 = vector.broadcast %cst_17 : f32 to vector<32x128xf32>
    %36 = arith.maximumf %34, %35 : vector<32x128xf32>
    %c0_18 = arith.constant 0 : index
    %c0_19 = arith.constant 0 : index
    %37 = vector.load %arg3[%c0_18, %c0_19] : memref<32x32xf32, #tpu.memory_space<vmem>>, vector<32x32xf32>
    %cst_20 = arith.constant dense<0.000000e+00> : vector<32x128xf32>
    %38 = tpu.matmul %37, %36, %cst_20 {dimension_numbers = #tpu.dot_dimension_numbers<[1], [0], [0], [1], [0, 0, 1, 1], [], []>} : vector<32x32xf32>, vector<32x128xf32>, vector<32x128xf32> -> vector<32x128xf32>
    %39 = vector.broadcast %3 : vector<32x1xf32> to vector<32x128xf32>
    %40 = arith.addf %38, %39 : vector<32x128xf32>
    %41 = vector.extract_strided_slice %40 {offsets = [0, 0], sizes = [16, 128], strides = [1, 1]} : vector<32x128xf32> to vector<16x128xf32>
    %42 = vector.extract_strided_slice %40 {offsets = [16, 0], sizes = [16, 128], strides = [1, 1]} : vector<32x128xf32> to vector<16x128xf32>
    %c0_21 = arith.constant 0 : index
    %c0_22 = arith.constant 0 : index
    %43 = vector.load %arg4[%c0_21, %c0_22] : memref<32x16xf32, #tpu.memory_space<vmem>>, vector<32x16xf32>
    %cst_23 = arith.constant dense<0.000000e+00> : vector<32x128xf32>
    %44 = tpu.matmul %43, %42, %cst_23 {dimension_numbers = #tpu.dot_dimension_numbers<[1], [0], [0], [1], [0, 0, 1, 1], [], []>} : vector<32x16xf32>, vector<16x128xf32>, vector<32x128xf32> -> vector<32x128xf32>
    %45 = vector.broadcast %4 : vector<32x1xf32> to vector<32x128xf32>
    %46 = arith.addf %44, %45 : vector<32x128xf32>
    %cst_24 = arith.constant dense<0.000000e+00> : vector<128xf32>
    %47 = vector.multi_reduction <add>, %46, %cst_24 [0] : vector<32x128xf32> to vector<128xf32>
    %48 = vector.shape_cast %47 : vector<128xf32> to vector<1x128xf32>
    %cst_25 = arith.constant 3.200000e+01 : f32
    %49 = vector.broadcast %cst_25 : f32 to vector<1x128xf32>
    %50 = arith.divf %48, %49 : vector<1x128xf32>
    %51 = vector.broadcast %50 : vector<1x128xf32> to vector<32x128xf32>
    %52 = arith.subf %46, %51 : vector<32x128xf32>
    %53 = arith.mulf %52, %52 : vector<32x128xf32>
    %cst_26 = arith.constant dense<0.000000e+00> : vector<128xf32>
    %54 = vector.multi_reduction <add>, %53, %cst_26 [0] : vector<32x128xf32> to vector<128xf32>
    %55 = vector.shape_cast %54 : vector<128xf32> to vector<1x128xf32>
    %cst_27 = arith.constant 3.200000e+01 : f32
    %56 = vector.broadcast %cst_27 : f32 to vector<1x128xf32>
    %57 = arith.divf %55, %56 : vector<1x128xf32>
    %58 = vector.broadcast %50 : vector<1x128xf32> to vector<32x128xf32>
    %59 = arith.subf %46, %58 : vector<32x128xf32>
    %cst_28 = arith.constant 9.99999974E-6 : f32
    %60 = vector.broadcast %cst_28 : f32 to vector<1x128xf32>
    %61 = arith.addf %57, %60 : vector<1x128xf32>
    %62 = math.rsqrt %61 : vector<1x128xf32>
    %63 = vector.broadcast %62 : vector<1x128xf32> to vector<32x128xf32>
    %64 = arith.mulf %59, %63 : vector<32x128xf32>
    %65 = vector.broadcast %5 : vector<32x1xf32> to vector<32x128xf32>
    %66 = arith.mulf %64, %65 : vector<32x128xf32>
    %67 = vector.broadcast %6 : vector<32x1xf32> to vector<32x128xf32>
    %68 = arith.addf %66, %67 : vector<32x128xf32>
    %cst_29 = arith.constant 0.000000e+00 : f32
    %69 = vector.broadcast %cst_29 : f32 to vector<32x128xf32>
    %70 = arith.maximumf %68, %69 : vector<32x128xf32>
    %c0_30 = arith.constant 0 : index
    %c0_31 = arith.constant 0 : index
    %71 = vector.load %arg5[%c0_30, %c0_31] : memref<32x32xf32, #tpu.memory_space<vmem>>, vector<32x32xf32>
    %cst_32 = arith.constant dense<0.000000e+00> : vector<32x128xf32>
    %72 = tpu.matmul %71, %70, %cst_32 {dimension_numbers = #tpu.dot_dimension_numbers<[1], [0], [0], [1], [0, 0, 1, 1], [], []>} : vector<32x32xf32>, vector<32x128xf32>, vector<32x128xf32> -> vector<32x128xf32>
    %73 = vector.broadcast %7 : vector<32x1xf32> to vector<32x128xf32>
    %74 = arith.addf %72, %73 : vector<32x128xf32>
    %75 = tpu.concatenate %74, %41, %42 in 0 : vector<32x128xf32>, vector<16x128xf32>, vector<16x128xf32> -> vector<64x128xf32>
    %c0_33 = arith.constant 0 : index
    %c0_34 = arith.constant 0 : index
    %76 = vector.load %arg7[%c0_33, %c0_34] : memref<64x128xf32, #tpu.memory_space<vmem>>, vector<64x128xf32>
    tpu.vector_store %arg7[%c0_33, %c0_34], %75 {strides = array<i32>} : memref<64x128xf32, #tpu.memory_space<vmem>>, vector<64x128xf32>,
    return
  }
  func.func @transform_0(%arg0: i32) -> (i32, i32) {
    %c0_i32 = arith.constant 0 : i32
    %c0_i32_0 = arith.constant 0 : i32
    return %c0_i32, %arg0 : i32, i32
  }
  func.func @transform_1(%arg0: i32) -> (i32, i32) {
    %c0_i32 = arith.constant 0 : i32
    %c0_i32_0 = arith.constant 0 : i32
    %c0_i32_1 = arith.constant 0 : i32
    return %c0_i32, %c0_i32_0 : i32, i32
  }
  func.func @transform_2(%arg0: i32) -> (i32, i32) {
    %c0_i32 = arith.constant 0 : i32
    %c0_i32_0 = arith.constant 0 : i32
    %c0_i32_1 = arith.constant 0 : i32
    return %c0_i32, %c0_i32_0 : i32, i32
  }
  func.func @transform_3(%arg0: i32) -> (i32, i32) {
    %c0_i32 = arith.constant 0 : i32
    %c0_i32_0 = arith.constant 0 : i32
    %c0_i32_1 = arith.constant 0 : i32
    return %c0_i32, %c0_i32_0 : i32, i32
  }
  func.func @transform_4(%arg0: i32) -> (i32, i32) {
    %c0_i32 = arith.constant 0 : i32
    %c0_i32_0 = arith.constant 0 : i32
    %c0_i32_1 = arith.constant 0 : i32
    return %c0_i32, %c0_i32_0 : i32, i32
  }
  func.func @transform_5(%arg0: i32) -> (i32, i32) {
    %c0_i32 = arith.constant 0 : i32
    %c0_i32_0 = arith.constant 0 : i32
    %c0_i32_1 = arith.constant 0 : i32
    return %c0_i32, %c0_i32_0 : i32, i32
  }
  func.func @transform_6(%arg0: i32) -> (i32, i32) {
    %c0_i32 = arith.constant 0 : i32
    %c0_i32_0 = arith.constant 0 : i32
    return %c0_i32, %arg0 : i32, i32
  }
}

</mosaic_0001>

<bundles_post_ra>
// kernel: tpu_custom_call.1
= control target key start
LH: loop header
LB: loop body
LE: loop exit
PB: predicated region body
PF: predicated region fallthrough
CT: control target
= control target key end

     0   :  { %11 = vsyncpa [#allocation3], 0  ;;  %s1131_s0 = inlined_call_operand.vmem [shape: f32[32,128], index: 0, kind: input, shape index: {}]   ;;  %s1132_s1 = inlined_call_operand.vmem [shape: f32[32,32], index: 1, kind: input, shape index: {}]   ;;  %s1133_s2 = inlined_call_operand.hbm [shape: f32[32,32], index: 2, kind: input, shape index: {}]   ;;  %s1134_s3 = inlined_call_operand.vmem [shape: f32[32,16], index: 3, kind: input, shape index: {}]   ;;  %s1135_s4 = inlined_call_operand.vmem [shape: f32[32,32], index: 4, kind: input, shape index: {}]   ;;  %s1136_s5 = inlined_call_operand.vmem [shape: f32[32,8], index: 5, kind: input, shape index: {}]   ;;  %s1137_s6 = inlined_call_operand.hbm [shape: f32[64,128], index: 6, kind: output, shape index: {}]  }
   0x1   :  { %12 = vsyncpa [#allocation4], 0  ;;  %s914_s21 = smov [#allocation2]   ;;  %s866_s25 = scalar_lea.hbm %s1133_s2, 512 }
   0x2   :  { %s22_s22 = sshll.u32 %s914_s21, 4  ;;  %p867_p0 = scmp.ne.s32.totalorder %s1133_s2, %s866_s25  ;;  %s23_s22 = int_to_ptr.vmem [resolvable:$true] %s22_s22 }
   0x3   :  { %p870_p1 = scmp.lt.u32.totalorder %s866_s25, %s1133_s2 }
   0x5   :  { %p872_p2 = pnand %p870_p1, %p867_p0 }
   0x7   :  { %875 = shalt.err (!%p872_p2)
}
   0x8   :  { %s876_s30 = scalar_lea.vmem %s23_s22, 512  ;;  %p881_p4 = scmp.lt.s32.totalorder %s23_s22, %s23_s22 }
   0x9   :  { %p877_p3 = scmp.ne.s32.totalorder %s23_s22, %s876_s30  ;;  %p882_p5 = scmp.lt.s32.totalorder %s876_s30, %s876_s30 }
   0xb   :  { %p883_p6 = por %p882_p5, %p881_p4 }
   0xd   :  { %p884_p7 = pnand %p883_p6, %p877_p3 }
   0xf   :  { %887 = shalt.err (!%p884_p7)
}
  0x10   :  { %s915_s7 = smov 128   ;;  %s916_s8 = smov 8  }
  0x11   :  { %28 = dma.hbm_to_vmem [thread:$0]  %s1133_s2, 512, %s23_s22, [#allocation3], %s915_s7, %s915_s7, %s916_s8  }
  0x12   :  { %910 = dma.done.wait [#allocation3], 512  }
  0x13   :  { %911 = vsyncadd [#allocation3], 4294966784  ;;  %v917_v0 = vmov 0   ;;  %vm70_vm0 = vcmask 261120   ;;  %v42_v1 = vld [vmem:[%s1131_s0] sm:$0xff]  ;;  %v43_v2 = vld [vmem:[%s1131_s0 + $0x8] sm:$0xff] }
  0x14   :  { %840 = vset.pattern.permute.xlu0 %v917_v0  ;;  %841 = vset.pattern.permute.xlu1 %v917_v0  ;;  %v44_v3 = vld [vmem:[%s1131_s0 + $0x10] sm:$0xff]  ;;  %v800_v4 = vpack.c.bf16 %v43_v2, %v42_v1  ;;  %v45_v5 = vld [vmem:[%s1131_s0 + $0x18] sm:$0xff]  ;;  %v46_v6 = vld [vmem:[%s1132_s1] sm:$0xff]  ;;  %v918_v14 = vmov 1   ;;  %v919_v16 = vmov 2   ;;  %v920_v18 = vmov 3  }
  0x15   :  { %v804_v7 = vpack.c.bf16 %v45_v5, %v44_v3  ;;  %756 = vmatprep.mubr.msk.f32.mxu0 %vm70_vm0, %v46_v6  ;;  %v995_v8 = vld [vmem:[%s1136_s5] sm:$0xff]  ;;  %v1001_v9 = vld [vmem:[%s1136_s5 + $0x10] sm:$0xff]  ;;  %v1007_v10 = vld [vmem:[%s1136_s5 + $0x8] sm:$0xff]  ;;  %v921_v19 = vmov 4   ;;  %v922_v20 = vmov 5   ;;  %v923_v21 = vmov 6  }
  0x16   :  { %801 = vmatprep.subr.bf16.mxu0 %v800_v4  ;;  %52 = vperm.xlu0 %840, %v995_v8   ;;  %v1012_v11 = vld [vmem:[%s1136_s5 + $0x18] sm:$0xff]  ;;  %v47_v12 = vld [vmem:[%s1132_s1 + $0x8] sm:$0xff]  ;;  %v48_v13 = vld [vmem:[%s1132_s1 + $0x10] sm:$0xff]  ;;  %vm384_vm1 = vcmask 130048   ;;  %s925_s23 = smov [#allocation5]  }
  0x17   :  { %803 = vmatpush3.bf16.msra.mxu0 %v800_v4  ;;  %62 = vperm.xlu1 %841, %v1001_v9   ;;  %v49_v15 = vld [vmem:[%s1132_s1 + $0x18] sm:$0xff]  ;;  %v247_v17 = vld [vmem:[#allocation2] sm:$0xff]  ;;  %s690_s0 = sshll.u32 %s925_s23, 4  ;;  %s691_s0 = int_to_ptr.vmem [resolvable:$true] %s690_s0 }
  0x18   :  { %805 = vmatprep.subr.bf16.mxu0 %v804_v7  ;;  %770 = vmatprep.mubr.msk.f32.mxu1 %vm70_vm0, %v247_v17  ;;  %p893_p9 = scmp.lt.s32.totalorder %s691_s0, %s691_s0 }
  0x1a   :  { %57 = vperm.xlu0 %840, %v1007_v10  }
  0x1b   :  { %807 = vmatpush3.bf16.msra.mxu0 %v804_v7  ;;  %67 = vperm.xlu1 %841, %v1012_v11  }
  0x1e   :  { %757 = vmatmul.mubr.msk.f32.vlgmr.msra.gmra.mrb[0].mxu0 %vm70_vm0, %v47_v12  ;;  %842 = vset.pattern.permute.xlu0 %v918_v14 }
  0x1f   :  { %759 = vmatprep.mubr.msk.f32.mxu0 %vm70_vm0, %v48_v13  ;;  %843 = vset.pattern.permute.xlu1 %v918_v14 }
  0x20   :  { %208 = vperm.xlu1 %843, %v1007_v10   ;;  %204 = vperm.xlu0 %842, %v995_v8  }
  0x22   :  { %760 = vmatmul.mubr.msk.f32.gmra.mrb[2].mxu0 %vm70_vm0, %v49_v15 }
  0x24   :  { %844 = vset.pattern.permute.xlu1 %v919_v16  ;;  %845 = vset.pattern.permute.xlu0 %v919_v16 }
  0x25   :  { %224 = vperm.xlu1 %844, %v995_v8   ;;  %228 = vperm.xlu0 %845, %v1007_v10  }
  0x29   :  { %846 = vset.pattern.permute.xlu1 %v918_v14  ;;  %232 = vperm.xlu0 %845, %v1001_v9  }
  0x2a   :  { %212 = vperm.xlu1 %846, %v1001_v9  }
  0x2d   :  { %848 = vset.pattern.permute.xlu0 %v920_v18 }
  0x2e   :  { %216 = vperm.xlu1 %846, %v1012_v11   ;;  %260 = vperm.xlu0 %848, %v1001_v9  }
  0x32   :  { %847 = vset.pattern.permute.xlu1 %v919_v16  ;;  %851 = vset.pattern.permute.xlu0 %v921_v19 }
  0x33   :  { %236 = vperm.xlu1 %847, %v1012_v11   ;;  %373 = vperm.xlu0 %851, %v1007_v10  }
  0x37   :  { %849 = vset.pattern.permute.xlu1 %v920_v18  ;;  %852 = vset.pattern.permute.xlu0 %v922_v20 }
  0x38   :  { %264 = vperm.xlu1 %849, %v1012_v11   ;;  %517 = vperm.xlu0 %852, %v995_v8  }
  0x3c   :  { %850 = vset.pattern.permute.xlu1 %v921_v19  ;;  %855 = vset.pattern.permute.xlu0 %v923_v21 }
  0x3d   :  { %369 = vperm.xlu1 %850, %v995_v8   ;;  %541 = vperm.xlu0 %855, %v1007_v10  }
  0x41   :  { %377 = vperm.xlu1 %850, %v1001_v9   ;;  %545 = vperm.xlu0 %855, %v1001_v9  }
  0x45   :  { %381 = vperm.xlu1 %850, %v1012_v11   ;;  %858 = vset.pattern.permute.xlu0 %v920_v18 }
  0x46   :  { %252 = vperm.xlu0 %858, %v995_v8  }
  0x49   :  { %853 = vset.pattern.permute.xlu1 %v922_v20 }
  0x4a   :  { %521 = vperm.xlu1 %853, %v1007_v10  }
  0x4e   :  { %854 = vset.pattern.permute.xlu1 %v923_v21 }
  0x4f   :  { %537 = vperm.xlu1 %854, %v995_v8  }
  0x53   :  { %856 = vset.pattern.permute.xlu1 %v922_v20 }
  0x54   :  { %525 = vperm.xlu1 %856, %v1001_v9  }
  0x58   :  { %529 = vperm.xlu1 %856, %v1012_v11  }
  0x5c   :  { %857 = vset.pattern.permute.xlu1 %v923_v21 }
  0x5d   :  { %549 = vperm.xlu1 %857, %v1012_v11  }
  0x61   :  { %859 = vset.pattern.permute.xlu1 %v920_v18 }
  0x62   :  { %256 = vperm.xlu1 %859, %v1007_v10  }
  0x95   :  { %v53_v22 = vpop.permute.xlu0 %52 }
  0x96   :  { %v63_v24 = vpop.permute.xlu1 %62 }
  0x99   :  { %v58_v23 = vpop.permute.xlu0 %57 }
  0x9a   :  { %v68_v31 = vpop.permute.xlu1 %67 }
  0x9f   :  { %v209_v57 = vpop.permute.xlu1 %208  ;;  %v205_v2 = vpop.permute.xlu0 %204 }
  0xa4   :  { %v225_v62 = vpop.permute.xlu1 %224  ;;  %v229_v4 = vpop.permute.xlu0 %228 }
  0xa8   :  { %v233_v15 = vpop.permute.xlu0 %232 }
  0xa9   :  { %v213_v1 = vpop.permute.xlu1 %212 }
  0xad   :  { %v217_v3 = vpop.permute.xlu1 %216 }
  0xb2   :  { %v237_v14 = vpop.permute.xlu1 %236 }
  0xf1   :  { %v758_v25 = vpop.f32.mrb[0].mxu0 }
  0xf2   :  { %v155_v26 = vadd.f32 %v758_v25, %v58_v23  ;;  %v149_v27 = vpop.f32.mrb[1].mxu0 }
  0xf3   :  { %v150_v28 = vadd.f32 %v149_v27, %v53_v22 }
  0xf5   :  { %v168_v29 = vadd.f32 %v155_v26, %v150_v28  ;;  %v761_v30 = vpop.f32.mrb[2].mxu0 }
  0xf6   :  { %v159_v32 = vpop.f32.mrb[3].mxu0  ;;  %v165_v34 = vadd.f32 %v761_v30, %v68_v31  ;;  %v248_v30 = vld [vmem:[#allocation2 + $0x8] sm:$0xff]  ;;  %v249_v31 = vld [vmem:[#allocation2 + $0x10] sm:$0xff] }
  0xf7   :  { %v160_v33 = vadd.f32 %v159_v32, %v63_v24  ;;  %v250_v32 = vld [vmem:[#allocation2 + $0x18] sm:$0xff] }
  0xf9   :  { %v169_v35 = vadd.f32 %v168_v29, %v160_v33 }
  0xfb   :  { %v170_v36 = vadd.f32 %v169_v35, %v165_v34 }
  0xfd   :  { %v171_v37 = vrot.slane %v170_v36, 4 }
  0xff   :  { %v172_v38 = vadd.f32 %v171_v37, %v170_v36 }
 0x101   :  { %v173_v39 = vrot.slane %v172_v38, 2 }
 0x103   :  { %v174_v40 = vadd.f32 %v173_v39, %v172_v38  ;;  %v261_v39 = vpop.permute.xlu0 %260 }
 0x105   :  { %v175_v41 = vrot.slane %v174_v40, 1 }
 0x107   :  { %v176_v42 = vadd.f32 %v175_v41, %v174_v40  ;;  %v374_v41 = vpop.permute.xlu0 %373 }
 0x109   :  { %v178_v43 = vmul.f32 0.03125, %v176_v42 }
 0x10b   :  { %v181_v44 = vsub.f32 %v160_v33, %v178_v43  ;;  %v182_v45 = vsub.f32 %v165_v34, %v178_v43  ;;  %v179_v46 = vsub.f32 %v150_v28, %v178_v43  ;;  %v180_v47 = vsub.f32 %v155_v26, %v178_v43  ;;  %v364_v33 = vld [vmem:[%s1134_s3] sm:$0xff]  ;;  %v265_v34 = vpop.permute.xlu1 %264  ;;  %v1066_v43 = vpop.permute.xlu0 %517 }
 0x10c   :  { %780 = vmatprep.mubr.msk.f32.mxu0 %vm384_vm1, %v364_v33 }
 0x10d   :  { %v183_v48 = vmul.f32 %v179_v46, %v179_v46  ;;  %v184_v49 = vmul.f32 %v180_v47, %v180_v47  ;;  %v185_v50 = vmul.f32 %v181_v44, %v181_v44  ;;  %v186_v52 = vmul.f32 %v182_v45, %v182_v45 }
 0x10f   :  { %v187_v51 = vadd.f32 %v184_v49, %v183_v48  ;;  %v370_v35 = vpop.permute.xlu1 %369 }
 0x111   :  { %v188_v53 = vadd.f32 %v187_v51, %v185_v50 }
 0x113   :  { %v189_v54 = vadd.f32 %v188_v53, %v186_v52  ;;  %v378_v36 = vpop.permute.xlu1 %377 }
 0x115   :  { %v190_v55 = vrot.slane %v189_v54, 4 }
 0x117   :  { %v191_v56 = vadd.f32 %v190_v55, %v189_v54  ;;  %v382_v37 = vpop.permute.xlu1 %381 }
 0x119   :  { %v192_v58 = vrot.slane %v191_v56, 2 }
 0x11b   :  { %v193_v59 = vadd.f32 %v192_v58, %v191_v56  ;;  %v1060_v38 = vpop.permute.xlu1 %521 }
 0x11d   :  { %v194_v60 = vrot.slane %v193_v59, 1 }
 0x11f   :  { %v195_v61 = vadd.f32 %v194_v60, %v193_v59  ;;  %v1062_v40 = vpop.permute.xlu1 %537  ;;  %v365_v59 = vld [vmem:[%s1134_s3 + $0x8] sm:$0xff]  ;;  %v366_v60 = vld [vmem:[%s1134_s3 + $0x10] sm:$0xff] }
 0x121   :  { %v196_v63 = vmul.f32 0.03125, %v195_v61  ;;  %v367_v61 = vld [vmem:[%s1134_s3 + $0x18] sm:$0xff] }
 0x123   :  { %v197_v0 = vadd.f32 1e-05, %v196_v63  ;;  %v1064_v42 = vpop.permute.xlu1 %525  ;;  %v924_v63 = vmov 7  }
 0x124   :  { %860 = vset.pattern.permute.xlu1 %v924_v63  ;;  %861 = vset.pattern.permute.xlu0 %v924_v63 }
 0x125   :  { %862 = vrsqrt.f32 %v197_v0  ;;  %565 = vperm.xlu1 %860, %v995_v8   ;;  %569 = vperm.xlu0 %861, %v1007_v10  }
 0x129   :  { %573 = vperm.xlu1 %860, %v1001_v9  }
 0x12d   :  { %577 = vperm.xlu1 %860, %v1012_v11  }
 0x12f   :  { %v863_v5 = vpop.eup %862 }
 0x130   :  { %v200_v6 = vmul.f32 %v863_v5, %v180_v47  ;;  %v201_v7 = vmul.f32 %v863_v5, %v181_v44  ;;  %v199_v12 = vmul.f32 %v863_v5, %v179_v46  ;;  %v202_v13 = vmul.f32 %v863_v5, %v182_v45  ;;  %v1068_v44 = vpop.permute.xlu1 %529  ;;  %v1070_v45 = vpop.permute.xlu0 %541 }
 0x132   :  { %v220_v16 = vmul.f32 %v209_v57, %v200_v6  ;;  %v221_v17 = vmul.f32 %v213_v1, %v201_v7  ;;  %v219_v18 = vmul.f32 %v205_v2, %v199_v12  ;;  %v222_v19 = vmul.f32 %v217_v3, %v202_v13 }
 0x134   :  { %v239_v20 = vadd.f32 %v225_v62, %v219_v18  ;;  %v240_v21 = vadd.f32 %v229_v4, %v220_v16  ;;  %v242_v22 = vadd.f32 %v237_v14, %v222_v19  ;;  %v241_v23 = vadd.f32 %v233_v15, %v221_v17  ;;  %v1072_v46 = vpop.permute.xlu1 %549  ;;  %v1074_v47 = vpop.permute.xlu0 %545  ;;  %v560_v62 = vld [vmem:[%s1135_s4] sm:$0xff] }
 0x136   :  { %v243_v24 = vmax.f32 %v239_v20, 0.0  ;;  %v244_v25 = vmax.f32 %v240_v21, 0.0  ;;  %v246_v26 = vmax.f32 %v242_v22, 0.0  ;;  %v245_v27 = vmax.f32 %v241_v23, 0.0 }
 0x138   :  { %v812_v28 = vpack.c.bf16 %v246_v26, %v245_v27  ;;  %v808_v29 = vpack.c.bf16 %v244_v25, %v243_v24  ;;  %v257_v48 = vpop.permute.xlu1 %256  ;;  %v253_v49 = vpop.permute.xlu0 %252 }
 0x13a   :  { %809 = vmatprep.subr.bf16.mxu1 %v808_v29 }
 0x13b   :  { %811 = vmatpush3.bf16.msra.mxu1 %v808_v29 }
 0x13c   :  { %813 = vmatprep.subr.bf16.mxu1 %v812_v28 }
 0x13f   :  { %815 = vmatpush3.bf16.msra.mxu1 %v812_v28 }
 0x142   :  { %771 = vmatmul.mubr.msk.f32.vlgmr.msra.gmra.mrb[0].mxu1 %vm70_vm0, %v248_v30 }
 0x143   :  { %773 = vmatprep.mubr.msk.f32.mxu1 %vm70_vm0, %v249_v31 }
 0x146   :  { %774 = vmatmul.mubr.msk.f32.gmra.mrb[2].mxu1 %vm70_vm0, %v250_v32 }
 0x147   :  { %794 = vmatprep.mubr.msk.f32.mxu1 %vm70_vm0, %v560_v62 }
 0x215   :  { %v772_v50 = vpop.f32.mrb[0].mxu1 }
 0x216   :  { %v351_v51 = vadd.f32 %v772_v50, %v257_v48  ;;  %v345_v52 = vpop.f32.mrb[1].mxu1 }
 0x217   :  { %v346_v53 = vadd.f32 %v345_v52, %v253_v49 }
 0x218   :  { %682 = vst [vmem:[#allocation5 + $0x28] sm:$0xff] %v351_v51 }
 0x219   :  { %681 = vst [vmem:[#allocation5 + $0x20] sm:$0xff] %v346_v53  ;;  %v775_v54 = vpop.f32.mrb[2].mxu1 }
 0x21a   :  { %v361_v55 = vadd.f32 %v775_v54, %v265_v34  ;;  %v355_v56 = vpop.f32.mrb[3].mxu1 }
 0x21b   :  { %v356_v57 = vadd.f32 %v355_v56, %v261_v39 }
 0x21c   :  { %684 = vst [vmem:[#allocation5 + $0x38] sm:$0xff] %v361_v55 }
 0x21d   :  { %v816_v58 = vpack.c.bf16 %v361_v55, %v356_v57  ;;  %683 = vst [vmem:[#allocation5 + $0x30] sm:$0xff] %v356_v57 }
 0x21f   :  { %817 = vmatprep.subr.bf16.mxu0 %v816_v58 }
 0x220   :  { %819 = vmatpush3.bf16.msra.mxu0 %v816_v58 }
 0x223   :  { %781 = vmatmul.mubr.msk.f32.vlgmr.msra.gmra.mrb[4].mxu0 %vm384_vm1, %v365_v59 }
 0x224   :  { %783 = vmatprep.mubr.msk.f32.mxu0 %vm384_vm1, %v366_v60 }
 0x227   :  { %784 = vmatmul.mubr.msk.f32.gmra.mrb[6].mxu0 %vm384_vm1, %v367_v61 }
 0x2f6   :  { %v782_v0 = vpop.f32.mrb[4].mxu0 }
 0x2f7   :  { %v469_v1 = vadd.f32 %v782_v0, %v374_v41  ;;  %v463_v2 = vpop.f32.mrb[5].mxu0 }
 0x2f8   :  { %v464_v3 = vadd.f32 %v463_v2, %v370_v35 }
 0x2fa   :  { %v482_v4 = vadd.f32 %v469_v1, %v464_v3  ;;  %v785_v5 = vpop.f32.mrb[6].mxu0 }
 0x2fb   :  { %v473_v6 = vpop.f32.mrb[7].mxu0  ;;  %v479_v12 = vadd.f32 %v785_v5, %v382_v37 }
 0x2fc   :  { %v474_v7 = vadd.f32 %v473_v6, %v378_v36 }
 0x2fe   :  { %v483_v13 = vadd.f32 %v482_v4, %v474_v7 }
 0x300   :  { %v484_v14 = vadd.f32 %v483_v13, %v479_v12 }
 0x302   :  { %v485_v15 = vrot.slane %v484_v14, 4 }
 0x304   :  { %v486_v16 = vadd.f32 %v485_v15, %v484_v14 }
 0x306   :  { %v487_v8 = vrot.slane %v486_v16, 2 }
 0x308   :  { %v488_v17 = vadd.f32 %v487_v8, %v486_v16 }
 0x30a   :  { %v489_v10 = vrot.slane %v488_v17, 1 }
 0x30c   :  { %v490_v18 = vadd.f32 %v489_v10, %v488_v17 }
 0x30e   :  { %v491_v9 = vmul.f32 0.03125, %v490_v18 }
 0x310   :  { %v492_v19 = vsub.f32 %v464_v3, %v491_v9  ;;  %v493_v11 = vsub.f32 %v469_v1, %v491_v9  ;;  %v494_v20 = vsub.f32 %v474_v7, %v491_v9  ;;  %v495_v21 = vsub.f32 %v479_v12, %v491_v9 }
 0x312   :  { %v496_v22 = vmul.f32 %v492_v19, %v492_v19  ;;  %v497_v23 = vmul.f32 %v493_v11, %v493_v11  ;;  %v498_v24 = vmul.f32 %v494_v20, %v494_v20  ;;  %v499_v26 = vmul.f32 %v495_v21, %v495_v21 }
 0x314   :  { %v500_v25 = vadd.f32 %v497_v23, %v496_v22 }
 0x316   :  { %v501_v27 = vadd.f32 %v500_v25, %v498_v24 }
 0x318   :  { %v502_v28 = vadd.f32 %v501_v27, %v499_v26 }
 0x31a   :  { %v503_v29 = vrot.slane %v502_v28, 4 }
 0x31c   :  { %v504_v30 = vadd.f32 %v503_v29, %v502_v28 }
 0x31e   :  { %v505_v31 = vrot.slane %v504_v30, 2 }
 0x320   :  { %v506_v32 = vadd.f32 %v505_v31, %v504_v30 }
 0x322   :  { %v507_v33 = vrot.slane %v506_v32, 1 }
 0x324   :  { %v508_v34 = vadd.f32 %v507_v33, %v506_v32 }
 0x326   :  { %v509_v35 = vmul.f32 0.03125, %v508_v34 }
 0x328   :  { %v510_v36 = vadd.f32 1e-05, %v509_v35 }
 0x32a   :  { %864 = vrsqrt.f32 %v510_v36 }
 0x334   :  { %v865_v37 = vpop.eup %864 }
 0x335   :  { %v514_v39 = vmul.f32 %v865_v37, %v494_v20  ;;  %v512_v41 = vmul.f32 %v865_v37, %v492_v19  ;;  %v513_v48 = vmul.f32 %v865_v37, %v493_v11  ;;  %v515_v49 = vmul.f32 %v865_v37, %v495_v21 }
 0x337   :  { %v534_v50 = vmul.f32 %v1064_v42, %v514_v39  ;;  %v532_v51 = vmul.f32 %v1066_v43, %v512_v41  ;;  %v533_v52 = vmul.f32 %v1060_v38, %v513_v48  ;;  %v535_v53 = vmul.f32 %v1068_v44, %v515_v49  ;;  %v561_v38 = vld [vmem:[%s1135_s4 + $0x8] sm:$0xff]  ;;  %v563_v43 = vld [vmem:[%s1135_s4 + $0x18] sm:$0xff]  ;;  %v566_v44 = vpop.permute.xlu1 %565 }
 0x339   :  { %v552_v54 = vadd.f32 %v1062_v40, %v532_v51  ;;  %v553_v55 = vadd.f32 %v1070_v45, %v533_v52  ;;  %v554_v56 = vadd.f32 %v1074_v47, %v534_v50  ;;  %v555_v57 = vadd.f32 %v1072_v46, %v535_v53  ;;  %v562_v40 = vld [vmem:[%s1135_s4 + $0x10] sm:$0xff]  ;;  %v570_v46 = vpop.permute.xlu0 %569  ;;  %s888_s4 = scalar_lea.vmem %s691_s0, 1024 }
 0x33a   :  { %p889_p8 = scmp.ne.s32.totalorder %s691_s0, %s888_s4  ;;  %p894_p10 = scmp.lt.s32.totalorder %s888_s4, %s888_s4 }
 0x33b   :  { %v556_v58 = vmax.f32 %v552_v54, 0.0  ;;  %v557_v59 = vmax.f32 %v553_v55, 0.0  ;;  %v558_v60 = vmax.f32 %v554_v56, 0.0  ;;  %v559_v61 = vmax.f32 %v555_v57, 0.0  ;;  %v574_v45 = vpop.permute.xlu1 %573 }
 0x33c   :  { %p895_p11 = por %p894_p10, %p893_p9 }
 0x33d   :  { %v820_v62 = vpack.c.bf16 %v557_v59, %v556_v58  ;;  %v824_v42 = vpack.c.bf16 %v559_v61, %v558_v60 }
 0x33e   :  { %p896_p12 = pnand %p895_p11, %p889_p8 }
 0x33f   :  { %821 = vmatprep.subr.bf16.mxu1 %v820_v62  ;;  %v578_v2 = vpop.permute.xlu1 %577 }
 0x340   :  { %823 = vmatpush3.bf16.msra.mxu1 %v820_v62 }
 0x341   :  { %825 = vmatprep.subr.bf16.mxu1 %v824_v42 }
 0x344   :  { %827 = vmatpush3.bf16.msra.mxu1 %v824_v42 }
 0x347   :  { %795 = vmatmul.mubr.msk.f32.vlgmr.msra.gmra.mrb[4].mxu1 %vm70_vm0, %v561_v38 }
 0x348   :  { %797 = vmatprep.mubr.msk.f32.mxu1 %vm70_vm0, %v562_v40 }
 0x34b   :  { %798 = vmatmul.mubr.msk.f32.gmra.mrb[6].mxu1 %vm70_vm0, %v563_v43 }
 0x41a   :  { %v796_v47 = vpop.f32.mrb[4].mxu1 }
 0x41b   :  { %v658_v63 = vpop.f32.mrb[5].mxu1  ;;  %v664_v0 = vadd.f32 %v796_v47, %v570_v46 }
 0x41c   :  { %v659_v1 = vadd.f32 %v658_v63, %v566_v44 }
 0x41d   :  { %678 = vst [vmem:[#allocation5 + $0x8] sm:$0xff] %v664_v0 }
 0x41e   :  { %677 = vst [vmem:[#allocation5] sm:$0xff] %v659_v1  ;;  %v799_v3 = vpop.f32.mrb[6].mxu1 }
 0x41f   :  { %v674_v4 = vadd.f32 %v799_v3, %v578_v2  ;;  %v668_v5 = vpop.f32.mrb[7].mxu1 }
 0x420   :  { %v669_v6 = vadd.f32 %v668_v5, %v574_v45 }
 0x421   :  { %680 = vst [vmem:[#allocation5 + $0x18] sm:$0xff] %v674_v4 }
 0x422   :  { %679 = vst [vmem:[#allocation5 + $0x10] sm:$0xff] %v669_v6 }
 0x423   :  { %899 = shalt.err (!%p896_p12)
}
 0x424   :  { %s900_s26 = scalar_lea.hbm %s1137_s6, 1024 }
 0x425   :  { %p901_p13 = scmp.ne.s32.totalorder %s1137_s6, %s900_s26  ;;  %p904_p0 = scmp.lt.u32.totalorder %s900_s26, %s1137_s6 }
 0x427   :  { %p906_p1 = pnand %p904_p0, %p901_p13 }
 0x429   :  { %909 = shalt.err (!%p906_p1)
}
 0x42a   :  { %696 = dma.vmem_to_hbm [thread:$0]  %s691_s0, 1024, %s1137_s6, [#allocation4], %s915_s7, %s915_s7, %s916_s8  }
 0x42b   :  { %912 = dma.done.wait [#allocation4], 1024  }
 0x42c   :  { %913 = vsyncadd [#allocation4], 4294966272 }
 0x42d   :  { %700 = vsyncpa [#allocation3], 1 }
 0x42e   :  { %701 = vsyncpa [#allocation4], 1 }

</bundles_post_ra>
